<compile_context>
chip_gen: v6e
topology: v6e:2x2x1
jax: 0.10.0
libtpu: 0.0.40
codegen_flags: <defaults>
</compile_context>

<pallas_src>
import functools

import jax
import jax.numpy as jnp
from jax.experimental import pallas as pl
from jax.experimental.pallas import tpu as pltpu


# ----------------------------------------------------------------------------
# Fused kernel: (Conv3x3 pad=1  ->  BN(train)  ->  ReLU)  x 2
# ----------------------------------------------------------------------------
def _middle_block_kernel(x_ref, wb1_ref, wb2_ref,
                         g1_ref, be1_ref, g2_ref, be2_ref,
                         o_ref, *, N, H, W, C2, eps):
    # x_ref   : (N*H, W*C1)       lane-dense NHWC slab
    # wb*_ref : (3, W*Cb, W*C2)   banded conv weights (one band per kh,
    #                             kw taps + channel contraction + W padding
    #                             folded into the band)
    # g*/be*  : (1, W*C2)         BN gamma/beta tiled across W on lanes
    # o_ref   : (N*H, W*C2)       output slab
    M = N * H
    WC = W * C2
    inv_count = 1.0 / float(N * H * W)

    # 0/1 "same-channel" matrix, generated in-kernel (iota + compare is a few
    # VPU ops; saves a 64 KB HBM->VMEM operand DMA).
    li = jax.lax.broadcasted_iota(jnp.int32, (WC, WC), 0) % C2
    lj = jax.lax.broadcasted_iota(jnp.int32, (WC, WC), 1) % C2
    p = (li == lj).astype(jnp.float32)

    def conv(a, wb_ref):
        # 3x3 conv with padding=1.  Column padding is already inside the band;
        # row halo = sublane roll masked at per-image boundaries.
        rows = jax.lax.broadcasted_iota(jnp.int32, a.shape, 0) % H
        top = jnp.where(rows == 0, 0.0, pltpu.roll(a, shift=1, axis=0))      # in row h-1
        bot = jnp.where(rows == H - 1, 0.0, pltpu.roll(a, shift=M - 1, axis=0))  # in row h+1
        acc = jnp.dot(top, wb_ref[0], preferred_element_type=jnp.float32)
        acc = acc + jnp.dot(a, wb_ref[1], preferred_element_type=jnp.float32)
        acc = acc + jnp.dot(bot, wb_ref[2], preferred_element_type=jnp.float32)
        return acc

    def bn_relu(a, g_ref, be_ref):
        # Training-mode BN, one-pass stats: [sum(a); sum(a^2)] broadcast back
        # per channel with a single (2, WC) x (WC, WC) matmul.
        stats = jnp.concatenate(
            [jnp.sum(a, axis=0, keepdims=True),
             jnp.sum(a * a, axis=0, keepdims=True)], axis=0)         # (2, WC)
        stats = jnp.dot(stats, p, preferred_element_type=jnp.float32) * inv_count
        mean = stats[0:1, :]
        var = stats[1:2, :] - mean * mean                            # biased
        scale = g_ref[...] * jax.lax.rsqrt(var + eps)
        shift = be_ref[...] - mean * scale
        return jnp.maximum(a * scale + shift, 0.0)

    x = x_ref[...]
    y1 = bn_relu(conv(x, wb1_ref), g1_ref, be1_ref)
    y2 = bn_relu(conv(y1, wb2_ref), g2_ref, be2_ref)
    o_ref[...] = y2.astype(o_ref.dtype)


# ----------------------------------------------------------------------------
# Wrapper-side weight banding (layout plumbing; weights are tiny)
# ----------------------------------------------------------------------------
def _banded_weights(w, W):
    """w: (3, 3, Cin, Cout) HWIO -> (3, W*Cin, W*Cout).

    band[kh][wi*Cin + ci, wo*Cout + co] = w[kh, wi - wo + 1, ci, co]
    when 0 <= wi - wo + 1 < 3, else 0.  The zero entries also implement the
    W-axis zero padding, so the matmul LHS is the raw lane-dense slab.
    """
    _, _, Cin, Cout = w.shape
    wi = jnp.arange(W)[:, None]          # input column index
    wo = jnp.arange(W)[None, :]          # output column index
    kw = wi - wo + 1                     # (W, W) tap index
    valid = ((kw >= 0) & (kw < 3)).astype(w.dtype)[:, :, None, None]
    kw_c = jnp.clip(kw, 0, 2)
    bands = []
    for kh in range(3):
        b4 = w[kh][kw_c] * valid                           # (W, W, Cin, Cout)
        bands.append(jnp.transpose(b4, (0, 2, 1, 3)).reshape(W * Cin, W * Cout))
    return jnp.stack(bands, axis=0)


# ----------------------------------------------------------------------------
# MiddleBlock forward
# ----------------------------------------------------------------------------
def middle_block_forward(x_nchw, params, eps=1e-5):
    N, C1, H, W = x_nchw.shape
    C2 = params["w1"].shape[-1]

    # NCHW -> lane-dense (N*H, W*C1) slab (channels fastest on lanes).
    # TODO(synk): keep activations NHWC/lane-dense end-to-end at production
    # scale instead of transposing around every call.
    x2d = jnp.transpose(x_nchw, (0, 2, 3, 1)).reshape(N * H, W * C1)

    wb1 = _banded_weights(params["w1"], W)    # (3, W*C1, W*C2)
    wb2 = _banded_weights(params["w2"], W)    # (3, W*C2, W*C2)
    g1 = jnp.tile(params["g1"], W).reshape(1, W * C2)
    be1 = jnp.tile(params["be1"], W).reshape(1, W * C2)
    g2 = jnp.tile(params["g2"], W).reshape(1, W * C2)
    be2 = jnp.tile(params["be2"], W).reshape(1, W * C2)
    # NOTE: conv biases b1/b2 are intentionally not passed: training-mode BN
    # subtracts the batch mean, which cancels a per-channel constant exactly.
    # (If this kernel is reused with eval-mode running stats, pass the bias.)

    kernel = functools.partial(_middle_block_kernel,
                               N=N, H=H, W=W, C2=C2, eps=eps)
    vmem = pl.BlockSpec(memory_space=pltpu.MemorySpace.VMEM)
    o2d = pl.pallas_call(
        kernel,
        out_shape=jax.ShapeDtypeStruct((N * H, W * C2), jnp.float32),
        in_specs=[vmem] * 7,
        out_specs=vmem,
    )(x2d, wb1, wb2, g1, be1, g2, be2)

    # (N*H, W*C2) -> NCHW
    return jnp.transpose(o2d.reshape(N, H, W, C2), (0, 3, 1, 2))


# ----------------------------------------------------------------------------
# Pure-JAX reference (correctness check only)
# ----------------------------------------------------------------------------
def _ref_block(x, w, b, g, be, eps=1e-5):
    y = jax.lax.conv_general_dilated(
        x, w, window_strides=(1, 1), padding="SAME",
        dimension_numbers=("NCHW", "HWIO", "NCHW"),
        precision=jax.lax.Precision.HIGHEST)
    y = y + b[None, :, None, None]
    mean = y.mean(axis=(0, 2, 3), keepdims=True)
    var = ((y - mean) ** 2).mean(axis=(0, 2, 3), keepdims=True)
    y = (y - mean) * jax.lax.rsqrt(var + eps)
    y = y * g[None, :, None, None] + be[None, :, None, None]
    return jnp.maximum(y, 0.0)


def ref_forward(x, params):
    x = _ref_block(x, params["w1"], params["b1"], params["g1"], params["be1"])
    x = _ref_block(x, params["w2"], params["b2"], params["g2"], params["be2"])
    return x


# ----------------------------------------------------------------------------
def init_params(key, cin, cout):
    k1, k2, k3, k4 = jax.random.split(key, 4)
    return {
        # conv weights in HWIO layout: (3, 3, Cin, Cout)
        "w1": 0.1 * jax.random.normal(k1, (3, 3, cin, cout), jnp.float32),
        "b1": 0.1 * jax.random.normal(k2, (cout,), jnp.float32),
        "g1": jnp.ones((cout,), jnp.float32),    # BN weight (PyTorch default)
        "be1": jnp.zeros((cout,), jnp.float32),  # BN bias
        "w2": 0.1 * jax.random.normal(k3, (3, 3, cout, cout), jnp.float32),
        "b2": 0.1 * jax.random.normal(k4, (cout,), jnp.float32),
        "g2": jnp.ones((cout,), jnp.float32),
        "be2": jnp.zeros((cout,), jnp.float32),
    }


if __name__ == "__main__":
    key = jax.random.PRNGKey(0)
    kx, kp = jax.random.split(key)

    N, Cin, Cout, HW = 2, 4, 8, 16
    x = jax.random.normal(kx, (N, Cin, HW, HW), jnp.float32)  # NCHW
    params = init_params(kp, Cin, Cout)

    fwd = jax.jit(middle_block_forward)
    out = jax.block_until_ready(fwd(x, params))

    ref = jax.block_until_ready(ref_forward(x, params))
    assert out.shape == (N, Cout, HW, HW), out.shape
    max_err = float(jnp.max(jnp.abs(out - ref)))
    assert jnp.allclose(out, ref, atol=2e-3, rtol=2e-3), max_err

    print("KERNEL_OK")
</pallas_src>

<mosaic_0001>
module attributes {stable_mosaic.version = 11 : i64} {
  func.func @_middle_block_kernel(%arg0: memref<32x64xf32, #tpu.memory_space<vmem>>, %arg1: memref<3x64x128xf32, #tpu.memory_space<vmem>>, %arg2: memref<3x128x128xf32, #tpu.memory_space<vmem>>, %arg3: memref<1x128xf32, #tpu.memory_space<vmem>>, %arg4: memref<1x128xf32, #tpu.memory_space<vmem>>, %arg5: memref<1x128xf32, #tpu.memory_space<vmem>>, %arg6: memref<1x128xf32, #tpu.memory_space<vmem>>, %arg7: memref<32x128xf32, #tpu.memory_space<vmem>>) attributes {dimension_semantics = [], scalar_prefetch = 0 : i64, scratch_operands = 0 : i64, tpu.core_type = #tpu.core_type<tc>} {
    %0 = tpu.iota {dimensions = array<i32: 0>} : vector<128x128xi32>
    %c8_i32 = arith.constant 8 : i32
    %c0_i32 = arith.constant 0 : i32
    %1 = arith.cmpi eq, %c8_i32, %c0_i32 : i32
    %c1_i32 = arith.constant 1 : i32
    %2 = arith.select %1, %c1_i32, %c8_i32 : i32
    %3 = vector.broadcast %2 : i32 to vector<128x128xi32>
    %4 = arith.remsi %0, %3 : vector<128x128xi32>
    %c0_i32_0 = arith.constant 0 : i32
    %5 = vector.broadcast %c0_i32_0 : i32 to vector<128x128xi32>
    %6 = arith.cmpi ne, %4, %5 : vector<128x128xi32>
    %c0_i32_1 = arith.constant 0 : i32
    %7 = vector.broadcast %c0_i32_1 : i32 to vector<128x128xi32>
    %8 = arith.cmpi slt, %4, %7 : vector<128x128xi32>
    %c0_i32_2 = arith.constant 0 : i32
    %9 = arith.cmpi slt, %2, %c0_i32_2 : i32
    %10 = vector.broadcast %9 : i1 to vector<128x128xi1>
    %11 = vector.broadcast %10 : vector<128x128xi1> to vector<128x128xi1>
    %12 = arith.xori %8, %11 : vector<128x128xi1>
    %13 = arith.andi %12, %6 : vector<128x128xi1>
    %14 = vector.broadcast %2 : i32 to vector<128x128xi32>
    %15 = arith.addi %4, %14 : vector<128x128xi32>
    %16 = arith.select %13, %15, %4 : vector<128x128xi1>, vector<128x128xi32>
    %17 = tpu.iota {dimensions = array<i32: 1>} : vector<128x128xi32>
    %c8_i32_3 = arith.constant 8 : i32
    %c0_i32_4 = arith.constant 0 : i32
    %18 = arith.cmpi eq, %c8_i32_3, %c0_i32_4 : i32
    %c1_i32_5 = arith.constant 1 : i32
    %19 = arith.select %18, %c1_i32_5, %c8_i32_3 : i32
    %20 = vector.broadcast %19 : i32 to vector<128x128xi32>
    %21 = arith.remsi %17, %20 : vector<128x128xi32>
    %c0_i32_6 = arith.constant 0 : i32
    %22 = vector.broadcast %c0_i32_6 : i32 to vector<128x128xi32>
    %23 = arith.cmpi ne, %21, %22 : vector<128x128xi32>
    %c0_i32_7 = arith.constant 0 : i32
    %24 = vector.broadcast %c0_i32_7 : i32 to vector<128x128xi32>
    %25 = arith.cmpi slt, %21, %24 : vector<128x128xi32>
    %c0_i32_8 = arith.constant 0 : i32
    %26 = arith.cmpi slt, %19, %c0_i32_8 : i32
    %27 = vector.broadcast %26 : i1 to vector<128x128xi1>
    %28 = vector.broadcast %27 : vector<128x128xi1> to vector<128x128xi1>
    %29 = arith.xori %25, %28 : vector<128x128xi1>
    %30 = arith.andi %29, %23 : vector<128x128xi1>
    %31 = vector.broadcast %19 : i32 to vector<128x128xi32>
    %32 = arith.addi %21, %31 : vector<128x128xi32>
    %33 = arith.select %30, %32, %21 : vector<128x128xi1>, vector<128x128xi32>
    %34 = arith.cmpi eq, %16, %33 : vector<128x128xi32>
    %35 = arith.extui %34 : vector<128x128xi1> to vector<128x128xi32>
    %36 = arith.sitofp %35 : vector<128x128xi32> to vector<128x128xf32>
    %c0 = arith.constant 0 : index
    %c0_9 = arith.constant 0 : index
    %37 = vector.load %arg0[%c0, %c0_9] : memref<32x64xf32, #tpu.memory_space<vmem>>, vector<32x64xf32>
    %38 = tpu.iota {dimensions = array<i32: 0>} : vector<32x64xi32>
    %c16_i32 = arith.constant 16 : i32
    %c0_i32_10 = arith.constant 0 : i32
    %39 = arith.cmpi eq, %c16_i32, %c0_i32_10 : i32
    %c1_i32_11 = arith.constant 1 : i32
    %40 = arith.select %39, %c1_i32_11, %c16_i32 : i32
    %41 = vector.broadcast %40 : i32 to vector<32x64xi32>
    %42 = arith.remsi %38, %41 : vector<32x64xi32>
    %c0_i32_12 = arith.constant 0 : i32
    %43 = vector.broadcast %c0_i32_12 : i32 to vector<32x64xi32>
    %44 = arith.cmpi ne, %42, %43 : vector<32x64xi32>
    %c0_i32_13 = arith.constant 0 : i32
    %45 = vector.broadcast %c0_i32_13 : i32 to vector<32x64xi32>
    %46 = arith.cmpi slt, %42, %45 : vector<32x64xi32>
    %c0_i32_14 = arith.constant 0 : i32
    %47 = arith.cmpi slt, %40, %c0_i32_14 : i32
    %48 = vector.broadcast %47 : i1 to vector<32x64xi1>
    %49 = vector.broadcast %48 : vector<32x64xi1> to vector<32x64xi1>
    %50 = arith.xori %46, %49 : vector<32x64xi1>
    %51 = arith.andi %50, %44 : vector<32x64xi1>
    %52 = vector.broadcast %40 : i32 to vector<32x64xi32>
    %53 = arith.addi %42, %52 : vector<32x64xi32>
    %54 = arith.select %51, %53, %42 : vector<32x64xi1>, vector<32x64xi32>
    %c0_i32_15 = arith.constant 0 : i32
    %55 = vector.broadcast %c0_i32_15 : i32 to vector<32x64xi32>
    %56 = arith.cmpi eq, %54, %55 : vector<32x64xi32>
    %c1_i32_16 = arith.constant 1 : i32
    %57 = tpu.dynamic_rotate %37 by %c1_i32_16 dim 0 : vector<32x64xf32>, i32 -> vector<32x64xf32>
    %cst = arith.constant 0.000000e+00 : f32
    %58 = vector.broadcast %cst : f32 to vector<32x64xf32>
    %59 = arith.select %56, %58, %57 : vector<32x64xi1>, vector<32x64xf32>
    %c15_i32 = arith.constant 15 : i32
    %60 = vector.broadcast %c15_i32 : i32 to vector<32x64xi32>
    %61 = arith.cmpi eq, %54, %60 : vector<32x64xi32>
    %c31_i32 = arith.constant 31 : i32
    %62 = tpu.dynamic_rotate %37 by %c31_i32 dim 0 : vector<32x64xf32>, i32 -> vector<32x64xf32>
    %cst_17 = arith.constant 0.000000e+00 : f32
    %63 = vector.broadcast %cst_17 : f32 to vector<32x64xf32>
    %64 = arith.select %61, %63, %62 : vector<32x64xi1>, vector<32x64xf32>
    %c0_18 = arith.constant 0 : index
    %c0_19 = arith.constant 0 : index
    %c0_20 = arith.constant 0 : index
    %65 = vector.load %arg1[%c0_18, %c0_19, %c0_20] : memref<3x64x128xf32, #tpu.memory_space<vmem>>, vector<1x64x128xf32>
    %66 = vector.shape_cast %65 : vector<1x64x128xf32> to vector<64x128xf32>
    %cst_21 = arith.constant dense<0.000000e+00> : vector<32x128xf32>
    %67 = tpu.matmul %59, %66, %cst_21 {dimension_numbers = #tpu.dot_dimension_numbers<[1], [0], [0], [1], [0, 0, 1, 1], [], []>} : vector<32x64xf32>, vector<64x128xf32>, vector<32x128xf32> -> vector<32x128xf32>
    %c1 = arith.constant 1 : index
    %c0_22 = arith.constant 0 : index
    %c0_23 = arith.constant 0 : index
    %68 = vector.load %arg1[%c1, %c0_22, %c0_23] : memref<3x64x128xf32, #tpu.memory_space<vmem>>, vector<1x64x128xf32>
    %69 = vector.shape_cast %68 : vector<1x64x128xf32> to vector<64x128xf32>
    %cst_24 = arith.constant dense<0.000000e+00> : vector<32x128xf32>
    %70 = tpu.matmul %37, %69, %cst_24 {dimension_numbers = #tpu.dot_dimension_numbers<[1], [0], [0], [1], [0, 0, 1, 1], [], []>} : vector<32x64xf32>, vector<64x128xf32>, vector<32x128xf32> -> vector<32x128xf32>
    %71 = arith.addf %67, %70 : vector<32x128xf32>
    %c2 = arith.constant 2 : index
    %c0_25 = arith.constant 0 : index
    %c0_26 = arith.constant 0 : index
    %72 = vector.load %arg1[%c2, %c0_25, %c0_26] : memref<3x64x128xf32, #tpu.memory_space<vmem>>, vector<1x64x128xf32>
    %73 = vector.shape_cast %72 : vector<1x64x128xf32> to vector<64x128xf32>
    %cst_27 = arith.constant dense<0.000000e+00> : vector<32x128xf32>
    %74 = tpu.matmul %64, %73, %cst_27 {dimension_numbers = #tpu.dot_dimension_numbers<[1], [0], [0], [1], [0, 0, 1, 1], [], []>} : vector<32x64xf32>, vector<64x128xf32>, vector<32x128xf32> -> vector<32x128xf32>
    %75 = arith.addf %71, %74 : vector<32x128xf32>
    %cst_28 = arith.constant dense<0.000000e+00> : vector<128xf32>
    %76 = vector.multi_reduction <add>, %75, %cst_28 [0] : vector<32x128xf32> to vector<128xf32>
    %77 = vector.shape_cast %76 : vector<128xf32> to vector<1x128xf32>
    %78 = arith.mulf %75, %75 : vector<32x128xf32>
    %cst_29 = arith.constant dense<0.000000e+00> : vector<128xf32>
    %79 = vector.multi_reduction <add>, %78, %cst_29 [0] : vector<32x128xf32> to vector<128xf32>
    %80 = vector.shape_cast %79 : vector<128xf32> to vector<1x128xf32>
    %81 = tpu.concatenate %77, %80 in 0 : vector<1x128xf32>, vector<1x128xf32> -> vector<2x128xf32>
    %cst_30 = arith.constant dense<0.000000e+00> : vector<2x128xf32>
    %82 = tpu.matmul %81, %36, %cst_30 {dimension_numbers = #tpu.dot_dimension_numbers<[1], [0], [0], [1], [0, 0, 1, 1], [], []>} : vector<2x128xf32>, vector<128x128xf32>, vector<2x128xf32> -> vector<2x128xf32>
    %cst_31 = arith.constant 0.001953125 : f32
    %83 = vector.broadcast %cst_31 : f32 to vector<2x128xf32>
    %84 = arith.mulf %82, %83 : vector<2x128xf32>
    %85 = vector.extract_strided_slice %84 {offsets = [0, 0], sizes = [1, 128], strides = [1, 1]} : vector<2x128xf32> to vector<1x128xf32>
    %86 = vector.extract_strided_slice %84 {offsets = [1, 0], sizes = [1, 128], strides = [1, 1]} : vector<2x128xf32> to vector<1x128xf32>
    %87 = arith.mulf %85, %85 : vector<1x128xf32>
    %88 = arith.subf %86, %87 : vector<1x128xf32>
    %c0_32 = arith.constant 0 : index
    %c0_33 = arith.constant 0 : index
    %89 = vector.load %arg3[%c0_32, %c0_33] : memref<1x128xf32, #tpu.memory_space<vmem>>, vector<1x128xf32>
    %cst_34 = arith.constant 9.99999974E-6 : f32
    %90 = vector.broadcast %cst_34 : f32 to vector<1x128xf32>
    %91 = arith.addf %88, %90 : vector<1x128xf32>
    %92 = math.rsqrt %91 : vector<1x128xf32>
    %93 = arith.mulf %89, %92 : vector<1x128xf32>
    %c0_35 = arith.constant 0 : index
    %c0_36 = arith.constant 0 : index
    %94 = vector.load %arg4[%c0_35, %c0_36] : memref<1x128xf32, #tpu.memory_space<vmem>>, vector<1x128xf32>
    %95 = arith.mulf %85, %93 : vector<1x128xf32>
    %96 = arith.subf %94, %95 : vector<1x128xf32>
    %97 = vector.broadcast %93 : vector<1x128xf32> to vector<32x128xf32>
    %98 = arith.mulf %75, %97 : vector<32x128xf32>
    %99 = vector.broadcast %96 : vector<1x128xf32> to vector<32x128xf32>
    %100 = arith.addf %98, %99 : vector<32x128xf32>
    %cst_37 = arith.constant 0.000000e+00 : f32
    %101 = vector.broadcast %cst_37 : f32 to vector<32x128xf32>
    %102 = arith.maximumf %100, %101 : vector<32x128xf32>
    %103 = tpu.iota {dimensions = array<i32: 0>} : vector<32x128xi32>
    %c16_i32_38 = arith.constant 16 : i32
    %c0_i32_39 = arith.constant 0 : i32
    %104 = arith.cmpi eq, %c16_i32_38, %c0_i32_39 : i32
    %c1_i32_40 = arith.constant 1 : i32
    %105 = arith.select %104, %c1_i32_40, %c16_i32_38 : i32
    %106 = vector.broadcast %105 : i32 to vector<32x128xi32>
    %107 = arith.remsi %103, %106 : vector<32x128xi32>
    %c0_i32_41 = arith.constant 0 : i32
    %108 = vector.broadcast %c0_i32_41 : i32 to vector<32x128xi32>
    %109 = arith.cmpi ne, %107, %108 : vector<32x128xi32>
    %c0_i32_42 = arith.constant 0 : i32
    %110 = vector.broadcast %c0_i32_42 : i32 to vector<32x128xi32>
    %111 = arith.cmpi slt, %107, %110 : vector<32x128xi32>
    %c0_i32_43 = arith.constant 0 : i32
    %112 = arith.cmpi slt, %105, %c0_i32_43 : i32
    %113 = vector.broadcast %112 : i1 to vector<32x128xi1>
    %114 = vector.broadcast %113 : vector<32x128xi1> to vector<32x128xi1>
    %115 = arith.xori %111, %114 : vector<32x128xi1>
    %116 = arith.andi %115, %109 : vector<32x128xi1>
    %117 = vector.broadcast %105 : i32 to vector<32x128xi32>
    %118 = arith.addi %107, %117 : vector<32x128xi32>
    %119 = arith.select %116, %118, %107 : vector<32x128xi1>, vector<32x128xi32>
    %c0_i32_44 = arith.constant 0 : i32
    %120 = vector.broadcast %c0_i32_44 : i32 to vector<32x128xi32>
    %121 = arith.cmpi eq, %119, %120 : vector<32x128xi32>
    %c1_i32_45 = arith.constant 1 : i32
    %122 = tpu.dynamic_rotate %102 by %c1_i32_45 dim 0 : vector<32x128xf32>, i32 -> vector<32x128xf32>
    %cst_46 = arith.constant 0.000000e+00 : f32
    %123 = vector.broadcast %cst_46 : f32 to vector<32x128xf32>
    %124 = arith.select %121, %123, %122 : vector<32x128xi1>, vector<32x128xf32>
    %c15_i32_47 = arith.constant 15 : i32
    %125 = vector.broadcast %c15_i32_47 : i32 to vector<32x128xi32>
    %126 = arith.cmpi eq, %119, %125 : vector<32x128xi32>
    %c31_i32_48 = arith.constant 31 : i32
    %127 = tpu.dynamic_rotate %102 by %c31_i32_48 dim 0 : vector<32x128xf32>, i32 -> vector<32x128xf32>
    %cst_49 = arith.constant 0.000000e+00 : f32
    %128 = vector.broadcast %cst_49 : f32 to vector<32x128xf32>
    %129 = arith.select %126, %128, %127 : vector<32x128xi1>, vector<32x128xf32>
    %c0_50 = arith.constant 0 : index
    %c0_51 = arith.constant 0 : index
    %c0_52 = arith.constant 0 : index
    %130 = vector.load %arg2[%c0_50, %c0_51, %c0_52] : memref<3x128x128xf32, #tpu.memory_space<vmem>>, vector<1x128x128xf32>
    %131 = vector.shape_cast %130 : vector<1x128x128xf32> to vector<128x128xf32>
    %cst_53 = arith.constant dense<0.000000e+00> : vector<32x128xf32>
    %132 = tpu.matmul %124, %131, %cst_53 {dimension_numbers = #tpu.dot_dimension_numbers<[1], [0], [0], [1], [0, 0, 1, 1], [], []>} : vector<32x128xf32>, vector<128x128xf32>, vector<32x128xf32> -> vector<32x128xf32>
    %c1_54 = arith.constant 1 : index
    %c0_55 = arith.constant 0 : index
    %c0_56 = arith.constant 0 : index
    %133 = vector.load %arg2[%c1_54, %c0_55, %c0_56] : memref<3x128x128xf32, #tpu.memory_space<vmem>>, vector<1x128x128xf32>
    %134 = vector.shape_cast %133 : vector<1x128x128xf32> to vector<128x128xf32>
    %cst_57 = arith.constant dense<0.000000e+00> : vector<32x128xf32>
    %135 = tpu.matmul %102, %134, %cst_57 {dimension_numbers = #tpu.dot_dimension_numbers<[1], [0], [0], [1], [0, 0, 1, 1], [], []>} : vector<32x128xf32>, vector<128x128xf32>, vector<32x128xf32> -> vector<32x128xf32>
    %136 = arith.addf %132, %135 : vector<32x128xf32>
    %c2_58 = arith.constant 2 : index
    %c0_59 = arith.constant 0 : index
    %c0_60 = arith.constant 0 : index
    %137 = vector.load %arg2[%c2_58, %c0_59, %c0_60] : memref<3x128x128xf32, #tpu.memory_space<vmem>>, vector<1x128x128xf32>
    %138 = vector.shape_cast %137 : vector<1x128x128xf32> to vector<128x128xf32>
    %cst_61 = arith.constant dense<0.000000e+00> : vector<32x128xf32>
    %139 = tpu.matmul %129, %138, %cst_61 {dimension_numbers = #tpu.dot_dimension_numbers<[1], [0], [0], [1], [0, 0, 1, 1], [], []>} : vector<32x128xf32>, vector<128x128xf32>, vector<32x128xf32> -> vector<32x128xf32>
    %140 = arith.addf %136, %139 : vector<32x128xf32>
    %cst_62 = arith.constant dense<0.000000e+00> : vector<128xf32>
    %141 = vector.multi_reduction <add>, %140, %cst_62 [0] : vector<32x128xf32> to vector<128xf32>
    %142 = vector.shape_cast %141 : vector<128xf32> to vector<1x128xf32>
    %143 = arith.mulf %140, %140 : vector<32x128xf32>
    %cst_63 = arith.constant dense<0.000000e+00> : vector<128xf32>
    %144 = vector.multi_reduction <add>, %143, %cst_63 [0] : vector<32x128xf32> to vector<128xf32>
    %145 = vector.shape_cast %144 : vector<128xf32> to vector<1x128xf32>
    %146 = tpu.concatenate %142, %145 in 0 : vector<1x128xf32>, vector<1x128xf32> -> vector<2x128xf32>
    %cst_64 = arith.constant dense<0.000000e+00> : vector<2x128xf32>
    %147 = tpu.matmul %146, %36, %cst_64 {dimension_numbers = #tpu.dot_dimension_numbers<[1], [0], [0], [1], [0, 0, 1, 1], [], []>} : vector<2x128xf32>, vector<128x128xf32>, vector<2x128xf32> -> vector<2x128xf32>
    %cst_65 = arith.constant 0.001953125 : f32
    %148 = vector.broadcast %cst_65 : f32 to vector<2x128xf32>
    %149 = arith.mulf %147, %148 : vector<2x128xf32>
    %150 = vector.extract_strided_slice %149 {offsets = [0, 0], sizes = [1, 128], strides = [1, 1]} : vector<2x128xf32> to vector<1x128xf32>
    %151 = vector.extract_strided_slice %149 {offsets = [1, 0], sizes = [1, 128], strides = [1, 1]} : vector<2x128xf32> to vector<1x128xf32>
    %152 = arith.mulf %150, %150 : vector<1x128xf32>
    %153 = arith.subf %151, %152 : vector<1x128xf32>
    %c0_66 = arith.constant 0 : index
    %c0_67 = arith.constant 0 : index
    %154 = vector.load %arg5[%c0_66, %c0_67] : memref<1x128xf32, #tpu.memory_space<vmem>>, vector<1x128xf32>
    %cst_68 = arith.constant 9.99999974E-6 : f32
    %155 = vector.broadcast %cst_68 : f32 to vector<1x128xf32>
    %156 = arith.addf %153, %155 : vector<1x128xf32>
    %157 = math.rsqrt %156 : vector<1x128xf32>
    %158 = arith.mulf %154, %157 : vector<1x128xf32>
    %c0_69 = arith.constant 0 : index
    %c0_70 = arith.constant 0 : index
    %159 = vector.load %arg6[%c0_69, %c0_70] : memref<1x128xf32, #tpu.memory_space<vmem>>, vector<1x128xf32>
    %160 = arith.mulf %150, %158 : vector<1x128xf32>
    %161 = arith.subf %159, %160 : vector<1x128xf32>
    %162 = vector.broadcast %158 : vector<1x128xf32> to vector<32x128xf32>
    %163 = arith.mulf %140, %162 : vector<32x128xf32>
    %164 = vector.broadcast %161 : vector<1x128xf32> to vector<32x128xf32>
    %165 = arith.addf %163, %164 : vector<32x128xf32>
    %cst_71 = arith.constant 0.000000e+00 : f32
    %166 = vector.broadcast %cst_71 : f32 to vector<32x128xf32>
    %167 = arith.maximumf %165, %166 : vector<32x128xf32>
    %c0_72 = arith.constant 0 : index
    %c0_73 = arith.constant 0 : index
    %168 = vector.load %arg7[%c0_72, %c0_73] : memref<32x128xf32, #tpu.memory_space<vmem>>, vector<32x128xf32>
    tpu.vector_store %arg7[%c0_72, %c0_73], %167 {strides = array<i32>} : memref<32x128xf32, #tpu.memory_space<vmem>>, vector<32x128xf32>,
    return
  }
}

</mosaic_0001>

<bundles_post_ra>
// kernel: tile.23
= control target key start
LH: loop header
LB: loop body
LE: loop exit
PB: predicated region body
PF: predicated region fallthrough
CT: control target
= control target key end

     0   :  { %s28_s0 = inlined_call_operand.vmem [shape: f32[8], index: 0, kind: input, shape index: {}]   ;;  %s29_s1 = inlined_call_operand.vmem [shape: f32[16,8], index: 1, kind: output, shape index: {}]  }
   0x1   :  { %v4_v0 = vld [vmem:[%s28_s0] ss:$0 sm:$0xff] }
   0x2   :  { %5 = vst [vmem:[%s29_s1] sm:$0xff] %v4_v0  ;;  %8 = vst [vmem:[%s29_s1 + $0x8] sm:$0xff] %v4_v0 }

// kernel: tile.24
= control target key start
LH: loop header
LB: loop body
LE: loop exit
PB: predicated region body
PF: predicated region fallthrough
CT: control target
= control target key end

     0   :  { %s133_s10 = smov 120   ;;  %s134_s11 = smov 104   ;;  %vm3_vm0 = vcmask 64512   ;;  %vm9_vm1 = vcmask 1048512   ;;  %vm15_vm2 = vcmask 982912   ;;  %vm21_vm3 = vcmask 917312   ;;  %s209_s0 = inlined_call_operand.vmem [shape: f32[16,8], index: 0, kind: input, shape index: {}]   ;;  %s210_s1 = inlined_call_operand.vmem [shape: f32[1,128], index: 1, kind: output, shape index: {}]  }
   0x1   :  { %v103_v0 = vld [vmem:[%s209_s0 + $0xf] sm:$0x1]   ;;  %v105_v1 = vld [vmem:[%s209_s0 + $0xd] sm:$0x1]   ;;  %v104_v2 = vld [vmem:[%s209_s0 + $0xe] sm:$0x1]  }
   0x2   :  { %7 = vrot.lane.b32.xlu0 %v103_v0, %s133_s10  ;;  %19 = vrot.lane.b32.xlu1 %v105_v1, %s134_s11  ;;  %v106_v3 = vld [vmem:[%s209_s0 + $0xc] sm:$0x1]   ;;  %s135_s16 = smov 112   ;;  %s136_s17 = smov 96   ;;  %v107_v4 = vld [vmem:[%s209_s0 + $0xb] sm:$0x1]  }
   0x3   :  { %v108_v5 = vld [vmem:[%s209_s0 + $0xa] sm:$0x1]   ;;  %v2_v6 = vld [vmem:[%s209_s0] sm:$0x1]   ;;  %s137_s24 = smov 88   ;;  %s138_s25 = smov 80  }
   0x4   :  { %4 = vst.msk [vmem:[#allocation0] sm:$0x1] %vm3_vm0, %v2_v6   ;;  %v109_v7 = vld [vmem:[%s209_s0 + $0x9] sm:$0x1]   ;;  %v110_v8 = vld [vmem:[%s209_s0 + $0x8] sm:$0x1]  }
   0x5   :  { %s139_s30 = smov 72   ;;  %s140_s2 = smov 64   ;;  %v111_v9 = vld [vmem:[%s209_s0 + $0x7] sm:$0x1]   ;;  %v112_v10 = vld [vmem:[%s209_s0 + $0x6] sm:$0x1]  }
   0x6   :  { %13 = vrot.lane.b32.xlu0 %v104_v2, %s135_s16  ;;  %25 = vrot.lane.b32.xlu1 %v106_v3, %s136_s17  ;;  %s141_s7 = smov 56   ;;  %s142_s8 = smov 48   ;;  %v113_v11 = vld [vmem:[%s209_s0 + $0x5] sm:$0x1]   ;;  %v114_v12 = vld [vmem:[%s209_s0 + $0x4] sm:$0x1]  }
   0x7   :  { %s143_s13 = smov 40   ;;  %s144_s14 = smov 32   ;;  %v115_v13 = vld [vmem:[%s209_s0 + $0x3] sm:$0x1]   ;;  %v116_v14 = vld [vmem:[%s209_s0 + $0x2] sm:$0x1]  }
   0x8   :  { %s145_s19 = smov 24   ;;  %s146_s20 = smov 16   ;;  %v117_v15 = vld [vmem:[%s209_s0 + $0x1] sm:$0x1]   ;;  %vm27_vm4 = vcmask 851712   ;;  %vm33_vm5 = vcmask 786112  }
   0x9   :  { %s147_s0 = smov 8   ;;  %vm39_vm6 = vcmask 720512   ;;  %vm45_vm7 = vcmask 654912   ;;  %vm51_vm8 = vcmask 589312   ;;  %vm57_vm9 = vcmask 523712  }
   0xa   :  { %31 = vrot.lane.b32.xlu0 %v107_v4, %s137_s24  ;;  %37 = vrot.lane.b32.xlu1 %v108_v5, %s138_s25  ;;  %vm63_vm10 = vcmask 458112   ;;  %vm69_vm11 = vcmask 392512   ;;  %vm75_vm12 = vcmask 326912   ;;  %vm81_vm13 = vcmask 261312  }
   0xb   :  { %vm87_vm14 = vcmask 195712   ;;  %vm93_vm15 = vcmask 130112  }
   0xe   :  { %43 = vrot.lane.b32.xlu0 %v109_v7, %s139_s30  ;;  %49 = vrot.lane.b32.xlu1 %v110_v8, %s140_s2 }
  0x12   :  { %55 = vrot.lane.b32.xlu0 %v111_v9, %s141_s7  ;;  %61 = vrot.lane.b32.xlu1 %v112_v10, %s142_s8 }
  0x16   :  { %67 = vrot.lane.b32.xlu0 %v113_v11, %s143_s13  ;;  %73 = vrot.lane.b32.xlu1 %v114_v12, %s144_s14 }
  0x1a   :  { %79 = vrot.lane.b32.xlu0 %v115_v13, %s145_s19  ;;  %85 = vrot.lane.b32.xlu1 %v116_v14, %s146_s20 }
  0x1e   :  { %91 = vrot.lane.b32.xlu0 %v117_v15, %s147_s0 }
  0x74   :  { %v8_v16 = vpop.permute.xlu0 %7   ;;  %v20_v17 = vpop.permute.xlu1 %19  }
  0x75   :  { %10 = vst.msk [vmem:[#allocation0] sm:$0x1] %vm9_vm1, %v8_v16  }
  0x78   :  { %v14_v18 = vpop.permute.xlu0 %13   ;;  %v26_v19 = vpop.permute.xlu1 %25  }
  0x79   :  { %16 = vst.msk [vmem:[#allocation0] sm:$0x1] %vm15_vm2, %v14_v18  }
  0x7a   :  { %22 = vst.msk [vmem:[#allocation0] sm:$0x1] %vm21_vm3, %v20_v17  }
  0x7b   :  { %28 = vst.msk [vmem:[#allocation0] sm:$0x1] %vm27_vm4, %v26_v19  }
  0x7c   :  { %v32_v20 = vpop.permute.xlu0 %31   ;;  %v38_v21 = vpop.permute.xlu1 %37  }
  0x7d   :  { %34 = vst.msk [vmem:[#allocation0] sm:$0x1] %vm33_vm5, %v32_v20  }
  0x7e   :  { %40 = vst.msk [vmem:[#allocation0] sm:$0x1] %vm39_vm6, %v38_v21  }
  0x80   :  { %v44_v22 = vpop.permute.xlu0 %43   ;;  %v50_v23 = vpop.permute.xlu1 %49  }
  0x81   :  { %46 = vst.msk [vmem:[#allocation0] sm:$0x1] %vm45_vm7, %v44_v22  }
  0x82   :  { %52 = vst.msk [vmem:[#allocation0] sm:$0x1] %vm51_vm8, %v50_v23  }
  0x84   :  { %v56_v24 = vpop.permute.xlu0 %55   ;;  %v62_v25 = vpop.permute.xlu1 %61  }
  0x85   :  { %58 = vst.msk [vmem:[#allocation0] sm:$0x1] %vm57_vm9, %v56_v24  }
  0x86   :  { %64 = vst.msk [vmem:[#allocation0] sm:$0x1] %vm63_vm10, %v62_v25  }
  0x88   :  { %v68_v26 = vpop.permute.xlu0 %67   ;;  %v74_v27 = vpop.permute.xlu1 %73  }
  0x89   :  { %70 = vst.msk [vmem:[#allocation0] sm:$0x1] %vm69_vm11, %v68_v26  }
  0x8a   :  { %76 = vst.msk [vmem:[#allocation0] sm:$0x1] %vm75_vm12, %v74_v27  }
  0x8c   :  { %v80_v28 = vpop.permute.xlu0 %79   ;;  %v86_v29 = vpop.permute.xlu1 %85  }
  0x8d   :  { %82 = vst.msk [vmem:[#allocation0] sm:$0x1] %vm81_vm13, %v80_v28  }
  0x8e   :  { %88 = vst.msk [vmem:[#allocation0] sm:$0x1] %vm87_vm14, %v86_v29  }
  0x90   :  { %v92_v30 = vpop.permute.xlu0 %91  }
  0x91   :  { %94 = vst.msk [vmem:[#allocation0] sm:$0x1] %vm93_vm15, %v92_v30  }
  0x98   :  { %v99_v31 = vld [vmem:[#allocation0] sm:$0x1] }
  0x99   :  { %102 = vst [vmem:[%s210_s1] sm:$0x1] %v99_v31 }

// kernel: middle_block_forward.1
= control target key start
LH: loop header
LB: loop body
LE: loop exit
PB: predicated region body
PF: predicated region fallthrough
CT: control target
= control target key end

     0   :  { %v26_v0 = vlaneseq  ;;  %vm400_vm2 = vcmask 523264   ;;  %v2581_v51 = vmov 0  ;;  %v2583_v58 = vmov 0  ;;  %s2557_s1 = inlined_call_operand.vmem [shape: f32[3,64,128], index: 1, kind: input, shape index: {}]   ;;  %s2558_s0 = inlined_call_operand.vmem [shape: f32[32,64], index: 0, kind: input, shape index: {}]   ;;  %s2559_s2 = inlined_call_operand.vmem [shape: f32[3,128,128], index: 2, kind: input, shape index: {}]   ;;  %s2560_s3 = inlined_call_operand.vmem [shape: f32[1,128], index: 3, kind: input, shape index: {}]   ;;  %s2561_s4 = inlined_call_operand.vmem [shape: f32[1,128], index: 4, kind: input, shape index: {}]   ;;  %s2562_s5 = inlined_call_operand.vmem [shape: f32[1,128], index: 5, kind: input, shape index: {}]   ;;  %s2563_s6 = inlined_call_operand.vmem [shape: f32[1,128], index: 6, kind: input, shape index: {}]   ;;  %s2564_s7 = inlined_call_operand.vmem [shape: f32[32,128], index: 7, kind: output, shape index: {}]  }
   0x1   :  { %v1364_v1 = vld [vmem:[%s2557_s1 + $0x78] sm:$0xff]  ;;  %v1363_v3 = vld [vmem:[%s2557_s1 + $0x70] sm:$0xff]  ;;  %v1362_v5 = vld [vmem:[%s2557_s1 + $0x68] sm:$0xff]  ;;  %v1845_v63 = vmov 0.0  }
   0x2   :  { %v390_v2 = vld [vmem:[%s2557_s1 + $0x38] sm:$0xff]  ;;  %1587 = vmatprep.subr.mxu0 %v1364_v1  ;;  %v389_v4 = vld [vmem:[%s2557_s1 + $0x30] sm:$0xff]  ;;  %v388_v6 = vld [vmem:[%s2557_s1 + $0x28] sm:$0xff]  ;;  %v1908_v7 = vshrl.u32 %v26_v0, 7  ;;  %v236_v62 = vand.u32 127, %v26_v0 }
   0x3   :  { %1609 = vmatprep.subr.mxu1 %v390_v2  ;;  %1588 = vmatpush3.msra.mxu0 %v1364_v1  ;;  %v1361_v8 = vld [vmem:[%s2557_s1 + $0x60] sm:$0xff]  ;;  %v1924_v11 = vld [vmem:[%s2558_s0 + $0x18] sm:$0xff]  ;;  %v1359_v15 = vld [vmem:[%s2557_s1 + $0x50] sm:$0xff] }
   0x4   :  { %1610 = vmatpush3.msra.mxu1 %v390_v2  ;;  %1589 = vmatprep.subr.mxu0 %v1363_v3  ;;  %v387_v9 = vld [vmem:[%s2557_s1 + $0x20] sm:$0xff]  ;;  %v1360_v12 = vld [vmem:[%s2557_s1 + $0x58] sm:$0xff]  ;;  %v1933_v14 = vadd.s32 16, %v1908_v7  ;;  %v305_v17 = vand.u32 15, %v1908_v7  ;;  %v356_v18 = vrot.slane %v1924_v11, 7  ;;  %v385_v19 = vld [vmem:[%s2557_s1 + $0x10] sm:$0xff] }
   0x5   :  { %1611 = vmatprep.subr.mxu1 %v389_v4  ;;  %1590 = vmatpush3.msra.mxu0 %v1363_v3  ;;  %v1919_v10 = vld [vmem:[%s2558_s0] sm:$0xff]  ;;  %v386_v13 = vld [vmem:[%s2557_s1 + $0x18] sm:$0xff]  ;;  %vm2566_vm0 = vcmp.lt.s32.totalorder %v1908_v7, 1  ;;  %v1948_v20 = vld [vmem:[%s2558_s0 + $0x8] sm:$0xff]  ;;  %vm2565_vm4 = vcmp.lt.s32.totalorder %v1908_v7, 7  ;;  %v2014_v43 = vadd.s32 8, %v1908_v7 }
   0x6   :  { %1612 = vmatpush3.msra.mxu1 %v389_v4  ;;  %1591 = vmatprep.subr.mxu0 %v1362_v5  ;;  %v353_v16 = vrot.slane %v1919_v10, 7  ;;  %v1953_v21 = vld [vmem:[%s2558_s0 + $0x10] sm:$0xff]  ;;  %v1358_v22 = vld [vmem:[%s2557_s1 + $0x48] sm:$0xff]  ;;  %v319_v25 = vand.u32 15, %v1933_v14  ;;  %vm1963_vm1 = vcmp.eq.s32.totalorder %v305_v17, 0  ;;  %v354_v28 = vrot.slane %v1948_v20, 7 }
   0x7   :  { %1613 = vmatprep.subr.mxu1 %v388_v6  ;;  %1592 = vmatpush3.msra.mxu0 %v1362_v5  ;;  %v384_v23 = vld [vmem:[%s2557_s1 + $0x8] sm:$0xff]  ;;  %v355_v24 = vrot.slane %v1953_v21, 7  ;;  %v1357_v29 = vld [vmem:[%s2557_s1 + $0x40] sm:$0xff]  ;;  %v1380_v35 = vld [vmem:[%s2557_s1 + $0xb8] sm:$0xff]  ;;  %v370_v36 = vrot.slane %v1919_v10, 1  ;;  %v371_v37 = vrot.slane %v1948_v20, 1 }
   0x8   :  { %1614 = vmatpush3.msra.mxu1 %v388_v6  ;;  %1593 = vmatprep.subr.mxu0 %v1361_v8  ;;  %v361_v27 = vsel %vm2566_vm0, %v356_v18, %v353_v16  ;;  %v383_v30 = vld [vmem:[%s2557_s1] sm:$0xff]  ;;  %vm1978_vm3 = vcmp.eq.s32.totalorder %v319_v25, 0  ;;  %v360_v34 = vsel %vm2566_vm0, %v353_v16, %v354_v28  ;;  %v1379_v39 = vld [vmem:[%s2557_s1 + $0xb0] sm:$0xff]  ;;  %v1378_v41 = vld [vmem:[%s2557_s1 + $0xa8] sm:$0xff]  ;;  %v372_v46 = vrot.slane %v1953_v21, 1 }
   0x9   :  { %1615 = vmatprep.subr.mxu1 %v387_v9  ;;  %1594 = vmatpush3.msra.mxu0 %v1361_v8  ;;  %v362_v31 = vsel %vm1963_vm1, 0.0, %v361_v27  ;;  %v359_v33 = vsel %vm2566_vm0, %v354_v28, %v355_v24  ;;  %v358_v40 = vsel %vm2566_vm0, %v355_v24, %v356_v18  ;;  %v377_v42 = vsel %vm2565_vm4, %v370_v36, %v371_v37  ;;  %v1377_v44 = vld [vmem:[%s2557_s1 + $0xa0] sm:$0xff]  ;;  %v1376_v45 = vld [vmem:[%s2557_s1 + $0x98] sm:$0xff]  ;;  %v1375_v49 = vld [vmem:[%s2557_s1 + $0x90] sm:$0xff] }
   0xa   :  { %1616 = vmatpush3.msra.mxu1 %v387_v9  ;;  %1595 = vmatprep.subr.mxu0 %v1360_v12  ;;  %v364_v38 = vsel %vm1978_vm3, 0.0, %v359_v33  ;;  %v312_v47 = vand.u32 15, %v2014_v43  ;;  %v2029_v48 = vadd.s32 24, %v1908_v7  ;;  %v1374_v50 = vld [vmem:[%s2557_s1 + $0x88] sm:$0xff]  ;;  %v376_v52 = vsel %vm2565_vm4, %v371_v37, %v372_v46  ;;  %v1373_v55 = vld [vmem:[%s2557_s1 + $0x80] sm:$0xff]  ;;  %v1432_v32 = vld [vmem:[%s2559_s2 + $0x158] sm:$0xff] }
   0xb   :  { %1617 = vmatprep.subr.mxu1 %v386_v13  ;;  %1596 = vmatpush3.msra.mxu0 %v1360_v12  ;;  %v373_v53 = vrot.slane %v1924_v11, 1  ;;  %v42_v61 = vadd.s32 120, %v1908_v7  ;;  %v41_v1 = vadd.s32 112, %v1908_v7  ;;  %v2067_v3 = vand.u32 7, %v236_v62  ;;  %v1428_v5 = vld [vmem:[%s2559_s2 + $0x138] sm:$0xff]  ;;  %v1427_v0 = vld [vmem:[%s2559_s2 + $0x130] sm:$0xff] }
   0xc   :  { %1618 = vmatpush3.msra.mxu1 %v386_v13  ;;  %1597 = vmatprep.subr.mxu0 %v1359_v15  ;;  %vm2037_vm5 = vcmp.eq.s32.totalorder %v312_v47, 15  ;;  %v326_v54 = vand.u32 15, %v2029_v48  ;;  %v1846_v6 = vmov 1.0   ;;  %v40_v8 = vadd.s32 104, %v1908_v7  ;;  %v1424_v18 = vld [vmem:[%s2559_s2 + $0x118] sm:$0xff]  ;;  %v1422_v24 = vld [vmem:[%s2559_s2 + $0x108] sm:$0xff] }
   0xd   :  { %1619 = vmatprep.subr.mxu1 %v385_v19  ;;  %1598 = vmatpush3.msra.mxu0 %v1359_v15  ;;  %v2582_v51 = vsel %vm2037_vm5, 4294967295, %v2581_v51  ;;  %v380_v56 = vsel %vm2037_vm5, 0.0, %v376_v52  ;;  %v375_v57 = vsel %vm2565_vm4, %v372_v46, %v373_v53  ;;  %v378_v59 = vsel %vm2565_vm4, %v373_v53, %v370_v36  ;;  %v1425_v15 = vld [vmem:[%s2559_s2 + $0x120] sm:$0xff] }
   0xe   :  { %1620 = vmatpush3.msra.mxu1 %v385_v19  ;;  %1599 = vmatprep.subr.mxu0 %v1358_v22  ;;  %vm2052_vm6 = vcmp.eq.s32.totalorder %v326_v54, 15  ;;  %v152_v2 = vand.u32 7, %v42_v61  ;;  %v145_v4 = vand.u32 7, %v41_v1  ;;  %v138_v9 = vand.u32 7, %v40_v8 }
   0xf   :  { %1621 = vmatprep.subr.mxu1 %v384_v23  ;;  %1600 = vmatpush3.msra.mxu0 %v1358_v22  ;;  %v2584_v58 = vsel %vm2052_vm6, 4294967295, %v2583_v58  ;;  %v382_v60 = vsel %vm2052_vm6, 0.0, %v378_v59  ;;  %v38_v13 = vadd.s32 88, %v1908_v7  ;;  %v37_v17 = vadd.s32 80, %v1908_v7 }
  0x10   :  { %1622 = vmatpush3.msra.mxu1 %v384_v23  ;;  %1601 = vmatprep.subr.mxu0 %v1357_v29  ;;  %vm2070_vm7 = vcmp.eq.s32.totalorder %v152_v2, %v2067_v3  ;;  %vm2078_vm8 = vcmp.eq.s32.totalorder %v145_v4, %v2067_v3  ;;  %vm2090_vm9 = vcmp.eq.s32.totalorder %v138_v9, %v2067_v3  ;;  %v35_v23 = vadd.s32 64, %v1908_v7 }
  0x11   :  { %1623 = vmatprep.subr.mxu1 %v383_v30  ;;  %1602 = vmatpush3.msra.mxu0 %v1357_v29  ;;  %v124_v16 = vand.u32 7, %v38_v13  ;;  %v117_v19 = vand.u32 7, %v37_v17  ;;  %v34_v27 = vadd.s32 56, %v1908_v7  ;;  %v31_v37 = vadd.s32 32, %v1908_v7 }
  0x12   :  { %1603 = vmatprep.mubr.msk.f32.mxu0 %vm400_vm2, %v1919_v10  ;;  %1624 = vmatpush3.msra.mxu1 %v383_v30  ;;  %v39_v10 = vadd.s32 96, %v1908_v7  ;;  %v103_v25 = vand.u32 7, %v35_v23  ;;  %v33_v30 = vadd.s32 48, %v1908_v7  ;;  %v47_v46 = vand.u32 7, %v1908_v7 }
  0x13   :  { %1625 = vmatprep.mubr.msk.f32.mxu1 %vm400_vm2, %v362_v31  ;;  %1604 = vmatmul.mubr.msk.f32.vlgmr.msra.gmra.mxu0 %vm400_vm2, %v1948_v20  ;;  %vm2110_vm11 = vcmp.eq.s32.totalorder %v124_v16, %v2067_v3  ;;  %v36_v20 = vadd.s32 72, %v1908_v7  ;;  %vm2120_vm12 = vcmp.eq.s32.totalorder %v117_v19, %v2067_v3  ;;  %v96_v29 = vand.u32 7, %v34_v27  ;;  %v1421_v31 = vld [vmem:[%s2559_s2 + $0x100] sm:$0xff] }
  0x14   :  { %1626 = vmatmul.mubr.msk.f32.vlgmr.msra.gmra.mxu1 %vm400_vm2, %v360_v34  ;;  %1631 = vmatprep.subr.mxu0 %v1380_v35  ;;  %v131_v12 = vand.u32 7, %v39_v10  ;;  %vm2140_vm14 = vcmp.eq.s32.totalorder %v103_v25, %v2067_v3  ;;  %v89_v33 = vand.u32 7, %v33_v30  ;;  %v32_v34 = vadd.s32 40, %v1908_v7 }
  0x15   :  { %1606 = vmatprep.mubr.msk.f32.mxu0 %vm400_vm2, %v1953_v21  ;;  %1632 = vmatpush3.msra.mxu0 %v1380_v35  ;;  %v110_v22 = vand.u32 7, %v36_v20  ;;  %vm2150_vm15 = vcmp.eq.s32.totalorder %v96_v29, %v2067_v3  ;;  %vm2571_vm5 = vmmov 0   ;;  %v2615_v47 = vmov 0  ;;  %v1423_v21 = vld [vmem:[%s2559_s2 + $0x110] sm:$0xff] }
  0x16   :  { %1628 = vmatprep.mubr.msk.f32.mxu1 %vm400_vm2, %v364_v38  ;;  %1633 = vmatprep.subr.mxu0 %v1379_v39  ;;  %vm2100_vm10 = vcmp.eq.s32.totalorder %v131_v12, %v2067_v3  ;;  %v82_v36 = vand.u32 7, %v32_v34  ;;  %v2605_v38 = vmov 0 }
  0x17   :  { %1634 = vmatpush3.msra.mxu0 %v1379_v39  ;;  %1653 = vmatprep.subr.mxu1 %v1845_v63  ;;  %vm2130_vm13 = vcmp.eq.s32.totalorder %v110_v22, %v2067_v3  ;;  %v75_v39 = vand.u32 7, %v31_v37 }
  0x18   :  { %1629 = vmatmul.mubr.msk.f32.gmra.mxu1 %vm400_vm2, %v358_v40  ;;  %1635 = vmatprep.subr.mxu0 %v1378_v41  ;;  %vm2170_vm4 = vcmp.eq.s32.totalorder %v82_v36, %v2067_v3  ;;  %v2607_v40 = vmov 0 }
  0x19   :  { %1607 = vmatmul.mubr.msk.f32.gmra.mxu0 %vm400_vm2, %v1924_v11  ;;  %1654 = vmatpush3.msk.msra.mxu1 %vm2070_vm7, %v1846_v6  ;;  %v2606_v38 = vsel %vm2170_vm4, 4294967295, %v2605_v38  ;;  %vm2179_vm0 = vcmp.eq.s32.totalorder %v75_v39, %v2067_v3  ;;  %v1426_v11 = vld [vmem:[%s2559_s2 + $0x128] sm:$0xff] }
  0x1a   :  { %1636 = vmatpush3.msra.mxu0 %v1378_v41  ;;  %1647 = vmatprep.mubr.msk.f32.mxu0 %vm400_vm2, %v377_v42  ;;  %v2608_v40 = vsel %vm2179_vm0, 4294967295, %v2607_v40  ;;  %v68_v41 = vand.u32 7, %v2029_v48  ;;  %v61_v42 = vand.u32 7, %v1933_v14  ;;  %v2611_v14 = vmov 0 }
  0x1b   :  { %1637 = vmatprep.subr.mxu0 %v1377_v44  ;;  %1655 = vmatprep.subr.mxu1 %v1845_v63 }
  0x1c   :  { %1638 = vmatpush3.msra.mxu0 %v1377_v44  ;;  %1656 = vmatpush3.msk.msra.mxu1 %vm2078_vm8, %v1846_v6  ;;  %v54_v44 = vand.u32 7, %v2014_v43  ;;  %vm2191_vm6 = vcmp.eq.s32.totalorder %v68_v41, %v2067_v3  ;;  %v2613_v43 = vmov 0 }
  0x1d   :  { %1639 = vmatprep.subr.mxu0 %v1376_v45  ;;  %1657 = vmatprep.subr.mxu1 %v1845_v63 }
  0x1e   :  { %1640 = vmatpush3.msra.mxu0 %v1376_v45  ;;  %1658 = vmatpush3.msk.msra.mxu1 %vm2090_vm9, %v1846_v6  ;;  %v2609_v45 = vmov 0 }
  0x1f   :  { %1641 = vmatprep.subr.mxu0 %v1375_v49  ;;  %1659 = vmatprep.subr.mxu1 %v1845_v63  ;;  %v2610_v45 = vsel %vm2191_vm6, 4294967295, %v2609_v45 }
  0x20   :  { %1642 = vmatpush3.msra.mxu0 %v1375_v49  ;;  %1660 = vmatpush3.msk.msra.mxu1 %vm2100_vm10, %v1846_v6 }
  0x21   :  { %1643 = vmatprep.subr.mxu0 %v1374_v50  ;;  %1661 = vmatprep.subr.mxu1 %v1845_v63 }
  0x22   :  { %1644 = vmatpush3.msra.mxu0 %v1374_v50  ;;  %1662 = vmatpush3.msk.msra.mxu1 %vm2110_vm11, %v1846_v6 }
  0x23   :  { %1645 = vmatprep.subr.mxu0 %v1373_v55  ;;  %1663 = vmatprep.subr.mxu1 %v1845_v63 }
  0x24   :  { %1646 = vmatpush3.msra.mxu0 %v1373_v55  ;;  %1664 = vmatpush3.msk.msra.mxu1 %vm2120_vm12, %v1846_v6 }
  0x25   :  { %1648 = vmatmul.mubr.msk.f32.vlgmr.msra.gmra.mxu0 %vm400_vm2, %v380_v56  ;;  %1665 = vmatprep.subr.mxu1 %v1845_v63 }
  0x26   :  { %1650 = vmatprep.mubr.msk.f32.mxu0 %vm400_vm2, %v375_v57  ;;  %1666 = vmatpush3.msk.msra.mxu1 %vm2130_vm13, %v1846_v6 }
  0x27   :  { %1667 = vmatprep.subr.mxu1 %v1845_v63  ;;  %1685 = vmatprep.mubr.msk.f32.mxu1 %vm2571_vm5, %v1845_v63  ;;  %vm2217_vm5 = vcmp.eq.s32.totalorder %v47_v46, %v2067_v3 }
  0x28   :  { %1668 = vmatpush3.msk.msra.mxu1 %vm2140_vm14, %v1846_v6  ;;  %v2616_v47 = vsel %vm2217_vm5, 4294967295, %v2615_v47 }
  0x29   :  { %1651 = vmatmul.mubr.msk.f32.gmra.mxu0 %vm400_vm2, %v382_v60  ;;  %1669 = vmatprep.subr.mxu1 %v1845_v63  ;;  %vm2160_vm2 = vcmp.eq.s32.totalorder %v89_v33, %v2067_v3 }
  0x2a   :  { %1670 = vmatpush3.msk.msra.mxu1 %vm2150_vm15, %v1846_v6 }
  0x2b   :  { %1671 = vmatprep.subr.mxu1 %v1845_v63 }
  0x2c   :  { %1672 = vmatpush3.msk.msra.mxu1 %vm2160_vm2, %v1846_v6 }
  0x2d   :  { %1673 = vmatprep.subr.mxu1 %v1845_v63 }
  0x2e   :  { %1674 = vmatpush3.msk.msra.mxu1 %vm2170_vm4, %v1846_v6  ;;  %vm2208_vm4 = vcmp.eq.s32.totalorder %v54_v44, %v2067_v3 }
  0x2f   :  { %1675 = vmatprep.subr.mxu1 %v1845_v63  ;;  %v2614_v43 = vsel %vm2208_vm4, 4294967295, %v2613_v43 }
  0x30   :  { %1676 = vmatpush3.msk.msra.mxu1 %vm2179_vm0, %v1846_v6  ;;  %vm2202_vm0 = vcmp.eq.s32.totalorder %v61_v42, %v2067_v3 }
  0x31   :  { %1677 = vmatprep.subr.mxu1 %v1845_v63  ;;  %v2612_v14 = vsel %vm2202_vm0, 4294967295, %v2611_v14 }
  0x32   :  { %1678 = vmatpush3.msk.msra.mxu1 %vm2191_vm6, %v1846_v6  ;;  %vm1419_vm6 = vmneg %vm1978_vm3  ;;  %vm2622_vm3 = vnez %v2606_v38 }
  0x33   :  { %1679 = vmatprep.subr.mxu1 %v1845_v63 }
  0x34   :  { %1680 = vmatpush3.msk.msra.mxu1 %vm2202_vm0, %v1846_v6  ;;  %vm2619_vm0 = vmneg %vm1963_vm1 }
  0x35   :  { %1681 = vmatprep.subr.mxu1 %v1845_v63 }
  0x36   :  { %1682 = vmatpush3.msk.msra.mxu1 %vm2208_vm4, %v1846_v6 }
  0x37   :  { %1683 = vmatprep.subr.mxu1 %v1845_v63 }
  0x38   :  { %1684 = vmatpush3.msk.msra.mxu1 %vm2217_vm5, %v1846_v6  ;;  %vm2573_vm5 = vcmask 1040384  }
  0xd3   :  { %v1605_v48 = vpop.f32.mrf.mxu0 }
  0xd4   :  { %v1627_v49 = vpop.f32.mrf.mxu1 }
  0xd5   :  { %v479_v50 = vpop.f32.mrf.mxu0  ;;  %v582_v57 = vadd.f32 %v1627_v49, %v1605_v48 }
  0xd6   :  { %v576_v53 = vpop.f32.mrf.mxu1 }
  0xd7   :  { %v577_v59 = vadd.f32 %v576_v53, %v479_v50  ;;  %v1416_v50 = vld [vmem:[%s2559_s2 + $0xf8] sm:$0xff]  ;;  %v1414_v53 = vld [vmem:[%s2559_s2 + $0xe8] sm:$0xff] }
  0xd8   :  { %v1630_v54 = vpop.f32.mrf.mxu1  ;;  %1688 = vmatprep.subr.mxu0 %v1416_v50 }
  0xd9   :  { %v1608_v52 = vpop.f32.mrf.mxu0  ;;  %1689 = vmatpush3.msra.mxu0 %v1416_v50 }
  0xda   :  { %v586_v60 = vpop.f32.mrf.mxu1  ;;  %v592_v3 = vadd.f32 %v1630_v54, %v1608_v52  ;;  %v1415_v52 = vld [vmem:[%s2559_s2 + $0xf0] sm:$0xff]  ;;  %v892_v54 = vld [vmem:[%s2559_s2 + $0x78] sm:$0xff] }
  0xdb   :  { %v489_v55 = vpop.f32.mrf.mxu0  ;;  %1690 = vmatprep.subr.mxu0 %v1415_v52  ;;  %1726 = vmatprep.subr.mxu1 %v892_v54 }
  0xdc   :  { %v587_v4 = vadd.f32 %v586_v60, %v489_v55  ;;  %1691 = vmatpush3.msra.mxu0 %v1415_v52  ;;  %v1413_v55 = vld [vmem:[%s2559_s2 + $0xe0] sm:$0xff]  ;;  %v1411_v60 = vld [vmem:[%s2559_s2 + $0xd0] sm:$0xff] }
  0xdd   :  { %1692 = vmatprep.subr.mxu0 %v1414_v53 }
  0xde   :  { %1693 = vmatpush3.msra.mxu0 %v1414_v53 }
  0xdf   :  { %1694 = vmatprep.subr.mxu0 %v1413_v55 }
  0xe0   :  { %1695 = vmatpush3.msra.mxu0 %v1413_v55 }
  0xe5   :  { %v1649_v56 = vpop.f32.mrf.mxu0 }
  0xe6   :  { %v2228_v62 = vadd.f32 %v1649_v56, %v582_v57  ;;  %v891_v56 = vld [vmem:[%s2559_s2 + $0x70] sm:$0xff]  ;;  %v1412_v57 = vld [vmem:[%s2559_s2 + $0xd8] sm:$0xff] }
  0xe7   :  { %v682_v61 = vpop.f32.mrf.mxu0  ;;  %1696 = vmatprep.subr.mxu0 %v1412_v57 }
  0xe8   :  { %v2230_v1 = vadd.f32 %v682_v61, %v577_v59  ;;  %v715_v10 = vmul.f32 %v2228_v62, %v2228_v62  ;;  %v890_v59 = vld [vmem:[%s2559_s2 + $0x68] sm:$0xff]  ;;  %1697 = vmatpush3.msra.mxu0 %v1412_v57  ;;  %v889_v61 = vld [vmem:[%s2559_s2 + $0x60] sm:$0xff] }
  0xe9   :  { %v1652_v2 = vpop.f32.mrf.mxu0  ;;  %1698 = vmatprep.subr.mxu0 %v1411_v60 }
  0xea   :  { %v714_v8 = vmul.f32 %v2230_v1, %v2230_v1  ;;  %v705_v12 = vadd.f32 %v2228_v62, %v2230_v1  ;;  %v2238_v13 = vadd.f32 %v1652_v2, %v592_v3  ;;  %1699 = vmatpush3.msra.mxu0 %v1411_v60  ;;  %v1410_v2 = vld [vmem:[%s2559_s2 + $0xc8] sm:$0xff]  ;;  %v888_v3 = vld [vmem:[%s2559_s2 + $0x58] sm:$0xff] }
  0xeb   :  { %v692_v9 = vpop.f32.mrf.mxu0  ;;  %1700 = vmatprep.subr.mxu0 %v1410_v2 }
  0xec   :  { %v2240_v16 = vadd.f32 %v692_v9, %v587_v4  ;;  %v718_v17 = vadd.f32 %v715_v10, %v714_v8  ;;  %v717_v22 = vmul.f32 %v2238_v13, %v2238_v13  ;;  %1701 = vmatpush3.msra.mxu0 %v1410_v2  ;;  %v1409_v4 = vld [vmem:[%s2559_s2 + $0xc0] sm:$0xff]  ;;  %v887_v8 = vld [vmem:[%s2559_s2 + $0x50] sm:$0xff]  ;;  %v1408_v9 = vld [vmem:[%s2559_s2 + $0xb8] sm:$0xff] }
  0xed   :  { %1702 = vmatprep.subr.mxu0 %v1409_v4  ;;  %v886_v10 = vld [vmem:[%s2559_s2 + $0x48] sm:$0xff]  ;;  %v805_v2 = vld [vmem:[%s2560_s3] sm:$0x1] }
  0xee   :  { %v706_v19 = vadd.f32 %v705_v12, %v2240_v16  ;;  %v716_v20 = vmul.f32 %v2240_v16, %v2240_v16  ;;  %1703 = vmatpush3.msra.mxu0 %v1409_v4  ;;  %v1407_v12 = vld [vmem:[%s2559_s2 + $0xb0] sm:$0xff]  ;;  %v2358_v4 = vsub.s32 0, %v1908_v7 }
  0xef   :  { %1704 = vmatprep.subr.mxu0 %v1408_v9 }
  0xf0   :  { %v707_v23 = vadd.f32 %v706_v19, %v2238_v13  ;;  %v719_v25 = vadd.f32 %v718_v17, %v716_v20  ;;  %1705 = vmatpush3.msra.mxu0 %v1408_v9  ;;  %v885_v17 = vld [vmem:[%s2559_s2 + $0x40] sm:$0xff]  ;;  %v1406_v19 = vld [vmem:[%s2559_s2 + $0xa8] sm:$0xff]  ;;  %v884_v20 = vld [vmem:[%s2559_s2 + $0x38] sm:$0xff] }
  0xf1   :  { %1706 = vmatprep.subr.mxu0 %v1407_v12  ;;  %v826_v9 = vld [vmem:[%s2561_s4] sm:$0x1] }
  0xf2   :  { %v708_v27 = vrot.slane %v707_v23, 4  ;;  %v720_v29 = vadd.f32 %v719_v25, %v717_v22  ;;  %1707 = vmatpush3.msra.mxu0 %v1407_v12  ;;  %v1405_v22 = vld [vmem:[%s2559_s2 + $0xa0] sm:$0xff]  ;;  %v1404_v25 = vld [vmem:[%s2559_s2 + $0x98] sm:$0xff] }
  0xf3   :  { %1708 = vmatprep.subr.mxu0 %v1406_v19 }
  0xf4   :  { %v709_v30 = vadd.f32 %v708_v27, %v707_v23  ;;  %v721_v33 = vrot.slane %v720_v29, 4  ;;  %1709 = vmatpush3.msra.mxu0 %v1406_v19  ;;  %v883_v23 = vld [vmem:[%s2559_s2 + $0x30] sm:$0xff]  ;;  %v882_v27 = vld [vmem:[%s2559_s2 + $0x28] sm:$0xff] }
  0xf5   :  { %1710 = vmatprep.subr.mxu0 %v1405_v22 }
  0xf6   :  { %v710_v34 = vrot.slane %v709_v30, 2  ;;  %v722_v36 = vadd.f32 %v721_v33, %v720_v29  ;;  %1711 = vmatpush3.msra.mxu0 %v1405_v22  ;;  %v1403_v29 = vld [vmem:[%s2559_s2 + $0x90] sm:$0xff]  ;;  %v1402_v33 = vld [vmem:[%s2559_s2 + $0x88] sm:$0xff] }
  0xf7   :  { %1712 = vmatprep.subr.mxu0 %v1404_v25 }
  0xf8   :  { %v711_v37 = vadd.f32 %v710_v34, %v709_v30  ;;  %v723_v39 = vrot.slane %v722_v36, 2  ;;  %1713 = vmatpush3.msra.mxu0 %v1404_v25  ;;  %v881_v30 = vld [vmem:[%s2559_s2 + $0x20] sm:$0xff]  ;;  %v880_v34 = vld [vmem:[%s2559_s2 + $0x18] sm:$0xff] }
  0xf9   :  { %1714 = vmatprep.subr.mxu0 %v1403_v29 }
  0xfa   :  { %v712_v41 = vrot.slane %v711_v37, 1  ;;  %v724_v42 = vadd.f32 %v723_v39, %v722_v36  ;;  %1715 = vmatpush3.msra.mxu0 %v1403_v29  ;;  %v1401_v36 = vld [vmem:[%s2559_s2 + $0x80] sm:$0xff]  ;;  %v878_v39 = vld [vmem:[%s2559_s2 + $0x8] sm:$0xff] }
  0xfb   :  { %1716 = vmatprep.subr.mxu0 %v1402_v33 }
  0xfc   :  { %v725_v44 = vrot.slane %v724_v42, 1  ;;  %v713_v46 = vadd.f32 %v712_v41, %v711_v37  ;;  %v879_v37 = vld [vmem:[%s2559_s2 + $0x10] sm:$0xff]  ;;  %1717 = vmatpush3.msra.mxu0 %v1402_v33  ;;  %v1436_v41 = vld [vmem:[%s2559_s2 + $0x178] sm:$0xff] }
  0xfd   :  { %1718 = vmatprep.subr.mxu0 %v1401_v36 }
  0xfe   :  { %v726_v48 = vadd.f32 %v725_v44, %v724_v42  ;;  %1719 = vmatpush3.msra.mxu0 %v1401_v36  ;;  %v877_v42 = vld [vmem:[%s2559_s2] sm:$0xff] }
  0xff   :  { %1764 = vmatprep.subr.mxu0 %v1436_v41 }
 0x100   :  { %v728_v49 = vsel %vm2573_vm5, %v713_v46, %v726_v48  ;;  %vm2617_vm5 = vcmp.lt.s32.totalorder %v1908_v7, 1 }
 0x101   :  { %1686 = vmatmul.mubr.f32.vlgmr.msra.gmra.mxu1 %v728_v49  ;;  %vm2618_vm4 = vmmov %vm2617_vm5 }
 0x102   :  { %1727 = vmatpush3.msra.mxu1 %v892_v54  ;;  %v1848_v54 = vmov 1966171168   ;;  %vm2621_vm1 = vmmov %vm2618_vm4 }
 0x103   :  { %1728 = vmatprep.subr.mxu1 %v891_v56  ;;  %v810_v55 = vunpack.c.l.s4 %v1848_v54  ;;  %v1431_v54 = vld [vmem:[%s2559_s2 + $0x150] sm:$0xff] }
 0x104   :  { %1729 = vmatpush3.msra.mxu1 %v891_v56 }
 0x105   :  { %1730 = vmatprep.subr.mxu1 %v890_v59  ;;  %v811_v56 = vunpack.c.0.s8 %v810_v55  ;;  %v1430_v55 = vld [vmem:[%s2559_s2 + $0x148] sm:$0xff] }
 0x106   :  { %1731 = vmatpush3.msra.mxu1 %v890_v59 }
 0x107   :  { %1732 = vmatprep.subr.mxu1 %v889_v61  ;;  %v2350_v57 = vsub.s32 %v811_v56, %v1908_v7  ;;  %v1429_v56 = vld [vmem:[%s2559_s2 + $0x140] sm:$0xff] }
 0x108   :  { %1733 = vmatpush3.msra.mxu1 %v889_v61 }
 0x109   :  { %1734 = vmatprep.subr.mxu1 %v888_v3 }
 0x10a   :  { %1735 = vmatpush3.msra.mxu1 %v888_v3 }
 0x10b   :  { %1736 = vmatprep.subr.mxu1 %v887_v8 }
 0x10c   :  { %1737 = vmatpush3.msra.mxu1 %v887_v8 }
 0x10d   :  { %1738 = vmatprep.subr.mxu1 %v886_v10 }
 0x10e   :  { %1739 = vmatpush3.msra.mxu1 %v886_v10 }
 0x10f   :  { %1740 = vmatprep.subr.mxu1 %v885_v17 }
 0x110   :  { %1741 = vmatpush3.msra.mxu1 %v885_v17 }
 0x111   :  { %1742 = vmatprep.subr.mxu1 %v884_v20 }
 0x112   :  { %1743 = vmatpush3.msra.mxu1 %v884_v20 }
 0x113   :  { %1744 = vmatprep.subr.mxu1 %v883_v23 }
 0x114   :  { %1745 = vmatpush3.msra.mxu1 %v883_v23 }
 0x115   :  { %1746 = vmatprep.subr.mxu1 %v882_v27 }
 0x116   :  { %1747 = vmatpush3.msra.mxu1 %v882_v27 }
 0x117   :  { %1748 = vmatprep.subr.mxu1 %v881_v30 }
 0x118   :  { %1749 = vmatpush3.msra.mxu1 %v881_v30 }
 0x119   :  { %1750 = vmatprep.subr.mxu1 %v880_v34 }
 0x11a   :  { %1751 = vmatpush3.msra.mxu1 %v880_v34 }
 0x11b   :  { %1752 = vmatprep.subr.mxu1 %v879_v37 }
 0x11c   :  { %1753 = vmatpush3.msra.mxu1 %v879_v37 }
 0x11d   :  { %1754 = vmatprep.subr.mxu1 %v878_v39 }
 0x11e   :  { %1755 = vmatpush3.msra.mxu1 %v878_v39 }
 0x11f   :  { %1756 = vmatprep.subr.mxu1 %v877_v42 }
 0x120   :  { %1757 = vmatpush3.msra.mxu1 %v877_v42 }
 0x121   :  { %1802 = vmatprep.subr.mxu1 %v1845_v63 }
 0x1c1   :  { %v795_v44 = vpop.f32.mrf.mxu1 }
 0x1c2   :  { %v799_v46 = vmul.f32 0.001953125, %v795_v44 }
 0x1c3   :  { %v1687_v48 = vpop.f32.mrf.mxu1 }
 0x1c4   :  { %v800_v49 = vmul.f32 %v799_v46, %v799_v46  ;;  %v1434_v48 = vld [vmem:[%s2559_s2 + $0x168] sm:$0xff] }
 0x1c6   :  { %v802_v50 = vrot.slane %v800_v49, 7 }
 0x1c8   :  { %v804_v52 = vsub.f32 %v799_v46, %v802_v50 }
 0x1ca   :  { %v806_v53 = vadd.f32 1e-05, %v804_v52 }
 0x1cc   :  { %1841 = vrsqrt.f32 %v806_v53 }
 0x1d9   :  { %v1842_v59 = vpop.eup %1841 }
 0x1da   :  { %v815_v60 = vrot.slane %v1842_v59, %v2350_v57 }
 0x1dc   :  { %v816_v61 = vcombine.high %v815_v60, %v815_v60 }
 0x1de   :  { %v823_v3 = vrot.slane %v816_v61, %v2350_v57 }
 0x1e0   :  { %v825_v8 = vmul.f32 %v823_v3, %v805_v2 }
 0x1e2   :  { %v827_v10 = vmul.f32 %v825_v8, %v799_v46  ;;  %v833_v12 = vrot.slane %v825_v8, %v2358_v4 }
 0x1e4   :  { %v828_v17 = vsub.f32 %v826_v9, %v827_v10  ;;  %v835_v19 = vmul.f32 %v833_v12, %v2230_v1  ;;  %v836_v22 = vmul.f32 %v833_v12, %v2228_v62  ;;  %v837_v23 = vmul.f32 %v833_v12, %v2240_v16  ;;  %v1435_v62 = vld [vmem:[%s2559_s2 + $0x170] sm:$0xff] }
 0x1e5   :  { %v838_v25 = vmul.f32 %v833_v12, %v2238_v13 }
 0x1e6   :  { %v843_v20 = vrot.slane %v828_v17, %v2358_v4 }
 0x1e8   :  { %v845_v27 = vadd.f32 %v843_v20, %v835_v19  ;;  %v846_v29 = vadd.f32 %v843_v20, %v836_v22  ;;  %v847_v30 = vadd.f32 %v843_v20, %v837_v23  ;;  %v848_v33 = vadd.f32 %v843_v20, %v838_v25 }
 0x1ea   :  { %v2369_v34 = vmax.f32 %v845_v27, 0.0  ;;  %v2371_v36 = vmax.f32 %v846_v29, 0.0  ;;  %v2373_v37 = vmax.f32 %v847_v30, 0.0  ;;  %v2375_v39 = vmax.f32 %v848_v33, 0.0 }
 0x1ec   :  { %1720 = vmatprep.mubr.f32.mxu0 %v2369_v34  ;;  %v853_v1 = vrot.slane %v2369_v34, 7  ;;  %v856_v13 = vrot.slane %v2375_v39, 7  ;;  %v854_v16 = vrot.slane %v2371_v36, 7  ;;  %v855_v42 = vrot.slane %v2373_v37, 7 }
 0x1ed   :  { %1721 = vmatmul.mubr.f32.vlgmr.msra.gmra.mxu0 %v2371_v36  ;;  %v865_v49 = vrot.slane %v2369_v34, 1  ;;  %v866_v50 = vrot.slane %v2371_v36, 1  ;;  %v867_v28 = vrot.slane %v2373_v37, 1  ;;  %v868_v59 = vrot.slane %v2375_v39, 1 }
 0x1ee   :  { %1765 = vmatpush3.msra.mxu0 %v1436_v41  ;;  %1723 = vmatprep.mubr.f32.mxu0 %v2373_v37  ;;  %v860_v44 = vsel %vm2617_vm5, %v856_v13, %v853_v1  ;;  %v859_v46 = vsel %vm2618_vm4, %v853_v1, %v854_v16  ;;  %v1433_v41 = vld [vmem:[%s2559_s2 + $0x160] sm:$0xff]  ;;  %v858_v52 = vsel %vm2618_vm4, %v854_v16, %v855_v42 }
 0x1ef   :  { %1766 = vmatprep.subr.mxu0 %v1435_v62  ;;  %1758 = vmatprep.mubr.msk.f32.mxu1 %vm2619_vm0, %v860_v44  ;;  %vm2620_vm0 = vcmp.lt.s32.totalorder %v1908_v7, 7  ;;  %v857_v53 = vsel %vm2621_vm1, %v855_v42, %v856_v13  ;;  %vm2623_vm5 = vnez %v2582_v51  ;;  %vm2633_vm4 = vnez %v2616_v47 }
 0x1f0   :  { %1767 = vmatpush3.msra.mxu0 %v1435_v62  ;;  %1759 = vmatmul.mubr.f32.vlgmr.msra.gmra.mxu1 %v859_v46  ;;  %v871_v26 = vsel %vm2620_vm0, %v865_v49, %v866_v50 }
 0x1f1   :  { %1768 = vmatprep.subr.mxu0 %v1434_v48  ;;  %1724 = vmatmul.mubr.f32.gmra.mxu0 %v2375_v39 }
 0x1f2   :  { %1761 = vmatprep.mubr.msk.f32.mxu1 %vm1419_vm6, %v858_v52  ;;  %1769 = vmatpush3.msra.mxu0 %v1434_v48  ;;  %vm1437_vm6 = vmneg %vm2623_vm5 }
 0x1f3   :  { %1770 = vmatprep.subr.mxu0 %v1433_v41  ;;  %1796 = vmatprep.mubr.f32.mxu0 %v871_v26 }
 0x1f4   :  { %1771 = vmatpush3.msra.mxu0 %v1433_v41  ;;  %1762 = vmatmul.mubr.f32.gmra.mxu1 %v857_v53 }
 0x1f5   :  { %1772 = vmatprep.subr.mxu0 %v1432_v32  ;;  %1803 = vmatpush3.msk.msra.mxu1 %vm2070_vm7, %v1846_v6  ;;  %vm2624_vm7 = vnez %v2608_v40 }
 0x1f6   :  { %1773 = vmatpush3.msra.mxu0 %v1432_v32  ;;  %1804 = vmatprep.subr.mxu1 %v1845_v63 }
 0x1f7   :  { %1774 = vmatprep.subr.mxu0 %v1431_v54  ;;  %1805 = vmatpush3.msk.msra.mxu1 %vm2078_vm8, %v1846_v6  ;;  %vm2625_vm8 = vmmov %vm2620_vm0 }
 0x1f8   :  { %1775 = vmatpush3.msra.mxu0 %v1431_v54  ;;  %1806 = vmatprep.subr.mxu1 %v1845_v63  ;;  %v870_v35 = vsel %vm2625_vm8, %v866_v50, %v867_v28 }
 0x1f9   :  { %1776 = vmatprep.subr.mxu0 %v1430_v55  ;;  %1807 = vmatpush3.msk.msra.mxu1 %vm2090_vm9, %v1846_v6  ;;  %vm2626_vm9 = vmmov %vm2620_vm0 }
 0x1fa   :  { %1777 = vmatpush3.msra.mxu0 %v1430_v55  ;;  %1808 = vmatprep.subr.mxu1 %v1845_v63  ;;  %v869_v51 = vsel %vm2626_vm9, %v867_v28, %v868_v59  ;;  %v1306_v28 = vld [vmem:[%s2563_s6] sm:$0x1] }
 0x1fb   :  { %1778 = vmatprep.subr.mxu0 %v1429_v56  ;;  %1809 = vmatpush3.msk.msra.mxu1 %vm2100_vm10, %v1846_v6  ;;  %vm2627_vm10 = vnez %v2610_v45 }
 0x1fc   :  { %1779 = vmatpush3.msra.mxu0 %v1429_v56  ;;  %1810 = vmatprep.subr.mxu1 %v1845_v63 }
 0x1fd   :  { %1780 = vmatprep.subr.mxu0 %v1428_v5  ;;  %1811 = vmatpush3.msk.msra.mxu1 %vm2110_vm11, %v1846_v6  ;;  %vm2628_vm11 = vnez %v2584_v58 }
 0x1fe   :  { %1781 = vmatpush3.msra.mxu0 %v1428_v5  ;;  %1812 = vmatprep.subr.mxu1 %v1845_v63 }
 0x1ff   :  { %1782 = vmatprep.subr.mxu0 %v1427_v0  ;;  %1813 = vmatpush3.msk.msra.mxu1 %vm2120_vm12, %v1846_v6  ;;  %vm1439_vm12 = vmneg %vm2628_vm11 }
 0x200   :  { %1783 = vmatpush3.msra.mxu0 %v1427_v0  ;;  %1814 = vmatprep.subr.mxu1 %v1845_v63 }
 0x201   :  { %1784 = vmatprep.subr.mxu0 %v1426_v11  ;;  %1815 = vmatpush3.msk.msra.mxu1 %vm2130_vm13, %v1846_v6  ;;  %vm2629_vm13 = vnez %v2612_v14 }
 0x202   :  { %1785 = vmatpush3.msra.mxu0 %v1426_v11  ;;  %1816 = vmatprep.subr.mxu1 %v1845_v63 }
 0x203   :  { %1786 = vmatprep.subr.mxu0 %v1425_v15  ;;  %1817 = vmatpush3.msk.msra.mxu1 %vm2140_vm14, %v1846_v6  ;;  %vm2630_vm14 = vmmov 0  }
 0x204   :  { %1787 = vmatpush3.msra.mxu0 %v1425_v15  ;;  %1818 = vmatprep.subr.mxu1 %v1845_v63 }
 0x205   :  { %1788 = vmatprep.subr.mxu0 %v1424_v18  ;;  %1819 = vmatpush3.msk.msra.mxu1 %vm2150_vm15, %v1846_v6  ;;  %vm2631_vm15 = vmmov %vm2620_vm0  ;;  %vm2634_vm0 = vcmask 1040384  }
 0x206   :  { %1789 = vmatpush3.msra.mxu0 %v1424_v18  ;;  %1820 = vmatprep.subr.mxu1 %v1845_v63  ;;  %v872_v38 = vsel %vm2631_vm15, %v868_v59, %v865_v49  ;;  %v1285_v18 = vld [vmem:[%s2562_s5] sm:$0x1] }
 0x207   :  { %1790 = vmatprep.subr.mxu0 %v1423_v21  ;;  %1821 = vmatpush3.msk.msra.mxu1 %vm2160_vm2, %v1846_v6  ;;  %vm2632_vm2 = vnez %v2614_v43 }
 0x208   :  { %1791 = vmatpush3.msra.mxu0 %v1423_v21  ;;  %1822 = vmatprep.subr.mxu1 %v1845_v63 }
 0x209   :  { %1792 = vmatprep.subr.mxu0 %v1422_v24  ;;  %1823 = vmatpush3.msk.msra.mxu1 %vm2622_vm3, %v1846_v6 }
 0x20a   :  { %1793 = vmatpush3.msra.mxu0 %v1422_v24  ;;  %1824 = vmatprep.subr.mxu1 %v1845_v63 }
 0x20b   :  { %1794 = vmatprep.subr.mxu0 %v1421_v31  ;;  %1825 = vmatpush3.msk.msra.mxu1 %vm2624_vm7, %v1846_v6 }
 0x20c   :  { %1795 = vmatpush3.msra.mxu0 %v1421_v31  ;;  %1826 = vmatprep.subr.mxu1 %v1845_v63 }
 0x20d   :  { %1797 = vmatmul.mubr.msk.f32.vlgmr.msra.gmra.mxu0 %vm1437_vm6, %v870_v35  ;;  %1827 = vmatpush3.msk.msra.mxu1 %vm2627_vm10, %v1846_v6 }
 0x20e   :  { %1799 = vmatprep.mubr.f32.mxu0 %v869_v51  ;;  %1828 = vmatprep.subr.mxu1 %v1845_v63 }
 0x20f   :  { %1829 = vmatpush3.msk.msra.mxu1 %vm2629_vm13, %v1846_v6  ;;  %1834 = vmatprep.mubr.msk.f32.mxu1 %vm2630_vm14, %v1845_v63 }
 0x210   :  { %1830 = vmatprep.subr.mxu1 %v1845_v63 }
 0x211   :  { %1800 = vmatmul.mubr.msk.f32.gmra.mxu0 %vm1439_vm12, %v872_v38  ;;  %1831 = vmatpush3.msk.msra.mxu1 %vm2632_vm2, %v1846_v6 }
 0x212   :  { %1832 = vmatprep.subr.mxu1 %v1845_v63 }
 0x213   :  { %1833 = vmatpush3.msk.msra.mxu1 %vm2633_vm4, %v1846_v6 }
 0x2ad   :  { %v1722_v58 = vpop.f32.mrf.mxu0 }
 0x2af   :  { %v976_v40 = vpop.f32.mrf.mxu0 }
 0x2b0   :  { %v1760_v45 = vpop.f32.mrf.mxu1 }
 0x2b1   :  { %v1725_v14 = vpop.f32.mrf.mxu0  ;;  %v1067_v3 = vadd.f32 %v1760_v45, %v1722_v58 }
 0x2b2   :  { %v1061_v60 = vpop.f32.mrf.mxu1 }
 0x2b3   :  { %v986_v7 = vpop.f32.mrf.mxu0  ;;  %v1062_v8 = vadd.f32 %v1061_v60, %v976_v40 }
 0x2b4   :  { %v1763_v61 = vpop.f32.mrf.mxu1 }
 0x2b5   :  { %v1077_v63 = vadd.f32 %v1763_v61, %v1725_v14 }
 0x2b6   :  { %v1071_v9 = vpop.f32.mrf.mxu1 }
 0x2b7   :  { %v1072_v19 = vadd.f32 %v1071_v9, %v986_v7 }
 0x2cd   :  { %v1798_v2 = vpop.f32.mrf.mxu0 }
 0x2ce   :  { %v1183_v43 = vadd.f32 %v1798_v2, %v1067_v3 }
 0x2cf   :  { %v1163_v10 = vpop.f32.mrf.mxu0 }
 0x2d0   :  { %v1182_v12 = vadd.f32 %v1163_v10, %v1062_v8  ;;  %v1196_v6 = vmul.f32 %v1183_v43, %v1183_v43 }
 0x2d1   :  { %v1801_v17 = vpop.f32.mrf.mxu0 }
 0x2d2   :  { %v1195_v20 = vmul.f32 %v1182_v12, %v1182_v12  ;;  %v1186_v22 = vadd.f32 %v1183_v43, %v1182_v12  ;;  %v1185_v23 = vadd.f32 %v1801_v17, %v1077_v63 }
 0x2d3   :  { %v1173_v47 = vpop.f32.mrf.mxu0 }
 0x2d4   :  { %v1184_v25 = vadd.f32 %v1173_v47, %v1072_v19  ;;  %v1199_v27 = vadd.f32 %v1196_v6, %v1195_v20  ;;  %v1198_v33 = vmul.f32 %v1185_v23, %v1185_v23 }
 0x2d6   :  { %v1187_v29 = vadd.f32 %v1186_v22, %v1184_v25  ;;  %v1197_v30 = vmul.f32 %v1184_v25, %v1184_v25 }
 0x2d8   :  { %v1188_v34 = vadd.f32 %v1187_v29, %v1185_v23  ;;  %v1200_v36 = vadd.f32 %v1199_v27, %v1197_v30 }
 0x2da   :  { %v1189_v37 = vrot.slane %v1188_v34, 4  ;;  %v1201_v39 = vadd.f32 %v1200_v36, %v1198_v33 }
 0x2dc   :  { %v1190_v62 = vadd.f32 %v1189_v37, %v1188_v34  ;;  %v1202_v1 = vrot.slane %v1201_v39, 4 }
 0x2de   :  { %v1191_v13 = vrot.slane %v1190_v62, 2  ;;  %v1203_v16 = vadd.f32 %v1202_v1, %v1201_v39 }
 0x2e0   :  { %v1192_v42 = vadd.f32 %v1191_v13, %v1190_v62  ;;  %v1204_v44 = vrot.slane %v1203_v16, 2 }
 0x2e2   :  { %v1193_v46 = vrot.slane %v1192_v42, 1  ;;  %v1205_v48 = vadd.f32 %v1204_v44, %v1203_v16 }
 0x2e4   :  { %v1206_v49 = vrot.slane %v1205_v48, 1  ;;  %v1194_v50 = vadd.f32 %v1193_v46, %v1192_v42 }
 0x2e6   :  { %v1207_v41 = vadd.f32 %v1206_v49, %v1205_v48 }
 0x2e8   :  { %v1208_v52 = vsel %vm2634_vm0, %v1194_v50, %v1207_v41 }
 0x2e9   :  { %1835 = vmatmul.mubr.f32.vlgmr.msra.gmra.mxu1 %v1208_v52 }
 0x3a9   :  { %v1275_v26 = vpop.f32.mrf.mxu1 }
 0x3aa   :  { %v1279_v32 = vmul.f32 0.001953125, %v1275_v26 }
 0x3ab   :  { %v1836_v53 = vpop.f32.mrf.mxu1 }
 0x3ac   :  { %v1280_v54 = vmul.f32 %v1279_v32, %v1279_v32 }
 0x3ae   :  { %v1282_v55 = vrot.slane %v1280_v54, 7 }
 0x3b0   :  { %v1284_v56 = vsub.f32 %v1279_v32, %v1282_v55 }
 0x3b2   :  { %v1286_v5 = vadd.f32 1e-05, %v1284_v56 }
 0x3b4   :  { %1843 = vrsqrt.f32 %v1286_v5 }
 0x3c1   :  { %v1844_v0 = vpop.eup %1843 }
 0x3c2   :  { %v1295_v11 = vrot.slane %v1844_v0, %v2350_v57 }
 0x3c4   :  { %v1296_v15 = vcombine.high %v1295_v11, %v1295_v11 }
 0x3c6   :  { %v1303_v21 = vrot.slane %v1296_v15, %v2350_v57 }
 0x3c8   :  { %v1305_v24 = vmul.f32 %v1303_v21, %v1285_v18 }
 0x3ca   :  { %v1307_v31 = vmul.f32 %v1305_v24, %v1279_v32  ;;  %v1313_v59 = vrot.slane %v1305_v24, %v2358_v4 }
 0x3cc   :  { %v1308_v35 = vsub.f32 %v1306_v28, %v1307_v31  ;;  %v1315_v51 = vmul.f32 %v1313_v59, %v1182_v12  ;;  %v1316_v38 = vmul.f32 %v1313_v59, %v1183_v43  ;;  %v1317_v58 = vmul.f32 %v1313_v59, %v1184_v25 }
 0x3cd   :  { %v1318_v40 = vmul.f32 %v1313_v59, %v1185_v23 }
 0x3ce   :  { %v1323_v45 = vrot.slane %v1308_v35, %v2358_v4 }
 0x3d0   :  { %v1325_v14 = vadd.f32 %v1323_v45, %v1315_v51  ;;  %v1326_v60 = vadd.f32 %v1323_v45, %v1316_v38  ;;  %v1327_v7 = vadd.f32 %v1323_v45, %v1317_v58  ;;  %v1328_v61 = vadd.f32 %v1323_v45, %v1318_v40 }
 0x3d2   :  { %v1329_v57 = vmax.f32 %v1325_v14, 0.0  ;;  %v1330_v2 = vmax.f32 %v1326_v60, 0.0  ;;  %v1331_v3 = vmax.f32 %v1327_v7, 0.0  ;;  %v1332_v8 = vmax.f32 %v1328_v61, 0.0 }
 0x3d4   :  { %1333 = vst [vmem:[%s2564_s7] sm:$0xff] %v1329_v57  ;;  %1334 = vst [vmem:[%s2564_s7 + $0x8] sm:$0xff] %v1330_v2 }
 0x3d5   :  { %1335 = vst [vmem:[%s2564_s7 + $0x10] sm:$0xff] %v1331_v3  ;;  %1336 = vst [vmem:[%s2564_s7 + $0x18] sm:$0xff] %v1332_v8 }

</bundles_post_ra>
